<compile_context>
chip_gen: v5e
topology: v5e:2x2
jax: 0.10.0
libtpu: 0.0.40
codegen_flags: <defaults>
</compile_context>

<pallas_src>
import functools

import jax
import jax.numpy as jnp
from jax.experimental import pallas as pl
from jax.experimental.pallas import tpu as pltpu


_LANE = 128
_TARGET_STEP_BYTES = 4 * 1024 * 1024   # ~4 MiB of HBM traffic per grid step
_VMEM_BUDGET = 12 * 1024 * 1024        # block working-set cap (safe on v7x 64 MiB VMEM)
_VMEM_LIMIT = 32 * 1024 * 1024


def _round_up(a, b):
    return (a + b - 1) // b * b


def _choose_tm(hw, bytes_per_col, other_steps):
    """Lane-dense tile (multiple of 128) along the flattened spatial axis."""
    tm = _round_up(max(_TARGET_STEP_BYTES // bytes_per_col, _LANE), _LANE)
    cap = max((_VMEM_BUDGET // (2 * bytes_per_col)) // _LANE * _LANE, _LANE)
    tm = min(tm, cap, _round_up(hw, _LANE))
    # Keep >= 2 grid steps overall (pipelining + both v7x TensorCores).
    if other_steps * pl.cdiv(hw, tm) < 2 and tm > _LANE:
        tm = _round_up(pl.cdiv(hw, 2), _LANE)
    return tm


# ---------------------------------------------------------------------------
# Kernel 1: pointwise (k==1) / im2col-fallback matmul.
#   out tile (Cout, TM) = Wfold (Cout, K) @ patches (K, TM), + bias, ReLU.
# Lane axis = flattened spatial, so stores are full-width and the HBM layout is
# already the per-image (Cout, Ho*Wo) slab of NCHW.
# ---------------------------------------------------------------------------
def _matmul_bn_relu_kernel(w_ref, p_ref, b_ref, o_ref):
    acc = jnp.dot(w_ref[...], p_ref[...], preferred_element_type=jnp.float32)
    o_ref[...] = jnp.maximum(acc + b_ref[...], 0.0).astype(o_ref.dtype)


# ---------------------------------------------------------------------------
# Kernel 2: fused direct conv (k>1, stride==1).
# One padded image per grid step, streamed as a flat (Cin, Lflat) block with
# row stride Wp.  Each tap (i, j) is a contiguous 2-D slice of that block, so
# the k*k taps reduce to k*k MXU matmuls accumulated in a VMEM scratch laid
# out in "wide" (Ho x Wp) coordinates; the epilogue extracts the Wo valid
# columns of each row, adds the folded BN bias and applies ReLU.
# No im2col matrix in HBM, no value reshapes/transposes in the kernel.
# ---------------------------------------------------------------------------
def _direct_conv_bn_relu_kernel(w_ref, x_ref, b_ref, o_ref, acc_ref, *, k, wp, ho, wo):
    m_wide = ho * wp
    for t in range(k * k):
        i, j = divmod(t, k)
        s = i * wp + j
        contrib = jnp.dot(w_ref[t], x_ref[:, s:s + m_wide],
                          preferred_element_type=jnp.float32)
        if t == 0:
            acc_ref[...] = contrib
        else:
            acc_ref[...] += contrib
    bias = b_ref[...]
    for r in range(ho):                     # drop the (k-1) wrap columns per row
        row = acc_ref[:, r * wp:r * wp + wo]
        o_ref[:, r * wo:(r + 1) * wo] = jnp.maximum(row + bias, 0.0).astype(o_ref.dtype)


# ---------------------------------------------------------------------------
# Wrapper: equivalent of Conv.forward (eval-mode BatchNorm).  NCHW in/out.
# ---------------------------------------------------------------------------
@functools.partial(jax.jit, static_argnames=("stride", "eps"))
def conv_bn_relu(x, weight, gamma, beta, running_mean, running_var,
                 *, stride=1, eps=1e-5):
    N, Cin, H, W = x.shape
    Cout, Cin_w, k, _ = weight.shape
    assert Cin == Cin_w
    pad = int((k - 1) / 2) * stride          # matches the PyTorch module
    Ho = (H + 2 * pad - k) // stride + 1
    Wo = (W + 2 * pad - k) // stride + 1
    hw = Ho * Wo
    K = Cin * k * k

    # Fold eval-mode BatchNorm into per-output-channel scale + bias.
    scale = gamma / jnp.sqrt(running_var + eps)
    bias = (beta - running_mean * scale).astype(jnp.float32).reshape(Cout, 1)

    def _params(sem):
        return pltpu.CompilerParams(dimension_semantics=sem,
                                    vmem_limit_bytes=_VMEM_LIMIT)

    # ---- fused direct-conv path: k > 1, stride == 1 --------------------------
    Hp, Wp = H + 2 * pad, W + 2 * pad
    m_wide = Ho * Wp
    l_flat = (Hp + 1) * Wp                  # +1 padded row keeps every tap slice in-bounds
    fused_vmem = (2 * Cin * l_flat * 4 + 2 * Cout * hw * 4      # in/out double buffers
                  + (Cout + Cin) * m_wide * 4                   # acc scratch + tap operand
                  + k * k * Cout * Cin * 4 + 4096)
    if k > 1 and stride == 1 and Ho <= 256 and fused_vmem <= _VMEM_BUDGET:
        w_taps = (weight * scale[:, None, None, None]).astype(jnp.float32)
        w_taps = w_taps.transpose(2, 3, 0, 1).reshape(k * k, Cout, Cin)
        xflat = jnp.pad(x, ((0, 0), (0, 0), (pad, pad + 1), (pad, pad)))
        xflat = xflat.reshape(N, Cin, l_flat)
        out = pl.pallas_call(
            functools.partial(_direct_conv_bn_relu_kernel, k=k, wp=Wp, ho=Ho, wo=Wo),
            out_shape=jax.ShapeDtypeStruct((N, Cout, hw), jnp.float32),
            grid=(N,),
            in_specs=[
                pl.BlockSpec((k * k, Cout, Cin), lambda n: (0, 0, 0)),   # folded taps
                pl.BlockSpec((None, Cin, l_flat), lambda n: (n, 0, 0)),  # flat padded img
                pl.BlockSpec((Cout, 1), lambda n: (0, 0)),               # BN bias
            ],
            out_specs=pl.BlockSpec((None, Cout, hw), lambda n: (n, 0, 0)),
            scratch_shapes=[pltpu.VMEM((Cout, m_wide), jnp.float32)],
            compiler_params=_params(("parallel",)),
        )(w_taps, xflat, bias)
        return out.reshape(N, Cout, Ho, Wo)   # free metadata reshape (already NCHW)

    # ---- matmul path: k == 1 (zero-copy) or im2col fallback -------------------
    w_mat = (weight.reshape(Cout, K) * scale[:, None]).astype(jnp.float32)
    if k == 1:
        # TODO(synk): for the rare stride>1 1x1 case, fold the subsampling into
        # the kernel's index_map instead of this XLA strided-slice copy.
        xs = x[:, :, ::stride, ::stride] if stride > 1 else x
        patches = xs.reshape(N, Cin, hw)                 # metadata-only reshape, f32
    else:
        # TODO(synk): halo-DMA row tiling (pl.ANY + make_async_copy) for k>1
        # configs that do not fit the fused path, instead of materializing the
        # k^2-inflated patch matrix in HBM.
        xp = jnp.pad(x, ((0, 0), (0, 0), (pad, pad), (pad, pad))) if pad else x
        cols = [xp[:, :, i:i + stride * Ho:stride, j:j + stride * Wo:stride]
                for i in range(k) for j in range(k)]
        # (N, Cin, k*k, Ho, Wo) -> (N, K, hw); K order (ci, i, j) matches w_mat.
        patches = jnp.stack(cols, axis=2).reshape(N, K, hw)

    TM = _choose_tm(hw, (K + Cout) * 4, N)
    Mp = _round_up(hw, TM)
    if Mp != hw:                                          # pad only the ragged tail
        patches = jnp.pad(patches, ((0, 0), (0, 0), (0, Mp - hw)))

    out = pl.pallas_call(
        _matmul_bn_relu_kernel,
        out_shape=jax.ShapeDtypeStruct((N, Cout, Mp), jnp.float32),
        grid=(N, Mp // TM),
        in_specs=[
            pl.BlockSpec((Cout, K), lambda n, i: (0, 0)),        # folded weight
            pl.BlockSpec((None, K, TM), lambda n, i: (n, 0, i)),  # per-image M tile
            pl.BlockSpec((Cout, 1), lambda n, i: (0, 0)),        # BN bias
        ],
        out_specs=pl.BlockSpec((None, Cout, TM), lambda n, i: (n, 0, i)),
        compiler_params=_params(("parallel", "parallel")),
    )(w_mat, patches, bias)
    if Mp != hw:
        out = out[:, :, :hw]
    return out.reshape(N, Cout, Ho, Wo)       # free metadata reshape (already NCHW)


# ---------------------------------------------------------------------------
# Demo / self-check
# ---------------------------------------------------------------------------
if __name__ == "__main__":
    key = jax.random.PRNGKey(0)
    kx, kw1, kw3, kg, kb, km, kv = jax.random.split(key, 7)

    # Module config: Conv(in_feat=4, out_feat=8); defaults kernel_size=1, stride=1.
    N, Cin, H, W = 2, 4, 16, 16
    Cout = 8

    x = jax.random.normal(kx, (N, Cin, H, W), dtype=jnp.float32)
    gamma = 1.0 + 0.1 * jax.random.normal(kg, (Cout,), dtype=jnp.float32)
    beta = 0.1 * jax.random.normal(kb, (Cout,), dtype=jnp.float32)
    running_mean = 0.1 * jax.random.normal(km, (Cout,), dtype=jnp.float32)
    running_var = jnp.abs(jax.random.normal(kv, (Cout,), dtype=jnp.float32)) + 0.5

    def reference(xv, w, stride):
        kk = w.shape[-1]
        p = int((kk - 1) / 2) * stride
        y = jax.lax.conv_general_dilated(
            xv, w, (stride, stride), [(p, p), (p, p)],
            dimension_numbers=("NCHW", "OIHW", "NCHW"),
            precision=jax.lax.Precision.HIGHEST)
        s = gamma / jnp.sqrt(running_var + 1e-5)
        b = beta - running_mean * s
        return jnp.maximum(y * s[None, :, None, None] + b[None, :, None, None], 0.0)

    # 1x1 conv (module default) -> tiled pointwise matmul path.
    w1 = 0.1 * jax.random.normal(kw1, (Cout, Cin, 1, 1), dtype=jnp.float32)
    out1 = jax.block_until_ready(
        conv_bn_relu(x, w1, gamma, beta, running_mean, running_var, stride=1))
    assert out1.shape == (N, Cout, H, W), out1.shape
    assert jnp.allclose(out1, reference(x, w1, 1), atol=2e-2, rtol=2e-2)

    # 3x3 conv -> fused direct-conv path (no im2col matrix in HBM).
    w3 = 0.1 * jax.random.normal(kw3, (Cout, Cin, 3, 3), dtype=jnp.float32)
    out3 = jax.block_until_ready(
        conv_bn_relu(x, w3, gamma, beta, running_mean, running_var, stride=1))
    assert out3.shape == (N, Cout, H, W), out3.shape
    assert jnp.allclose(out3, reference(x, w3, 1), atol=2e-2, rtol=2e-2)

    print("KERNEL_OK")
</pallas_src>

<mosaic_0001>
module attributes {stable_mosaic.version = 11 : i64} {
  func.func @_matmul_bn_relu_kernel(%arg0: i32, %arg1: i32, %arg2: memref<8x4xf32, #tpu.memory_space<vmem>>, %arg3: memref<1x4x256xf32, #tpu.memory_space<vmem>>, %arg4: memref<8x1xf32, #tpu.memory_space<vmem>>, %arg5: memref<1x8x256xf32, #tpu.memory_space<vmem>>) attributes {dimension_semantics = [#tpu.dimension_semantics<parallel>, #tpu.dimension_semantics<parallel>], iteration_bounds = array<i64: 2, 1>, scalar_prefetch = 0 : i64, scratch_operands = 0 : i64, tpu.core_type = #tpu.core_type<tc>, window_params = [{pipeline_mode = #tpu.pipeline_mode<synchronous>, transform_indices = @transform_0, window_bounds = array<i64: 8, 4>}, {transform_indices = @transform_1, window_bounds = array<i64: 1, 4, 256>}, {pipeline_mode = #tpu.pipeline_mode<synchronous>, transform_indices = @transform_2, window_bounds = array<i64: 8, 1>}, {transform_indices = @transform_3, window_bounds = array<i64: 1, 8, 256>}]} {
    %c0 = arith.constant 0 : index
    %c0_0 = arith.constant 0 : index
    %0 = vector.load %arg2[%c0, %c0_0] : memref<8x4xf32, #tpu.memory_space<vmem>>, vector<8x4xf32>
    %c0_1 = arith.constant 0 : index
    %c0_2 = arith.constant 0 : index
    %c0_3 = arith.constant 0 : index
    %1 = vector.load %arg3[%c0_1, %c0_2, %c0_3] : memref<1x4x256xf32, #tpu.memory_space<vmem>>, vector<1x4x256xf32>
    %2 = vector.shape_cast %1 : vector<1x4x256xf32> to vector<4x256xf32>
    %cst = arith.constant dense<0.000000e+00> : vector<8x256xf32>
    %3 = tpu.matmul %0, %2, %cst {dimension_numbers = #tpu.dot_dimension_numbers<[1], [0], [0], [1], [0, 0, 1, 1], [], []>} : vector<8x4xf32>, vector<4x256xf32>, vector<8x256xf32> -> vector<8x256xf32>
    %c0_4 = arith.constant 0 : index
    %c0_5 = arith.constant 0 : index
    %4 = vector.load %arg4[%c0_4, %c0_5] : memref<8x1xf32, #tpu.memory_space<vmem>>, vector<8x1xf32>
    %5 = vector.broadcast %4 : vector<8x1xf32> to vector<8x256xf32>
    %6 = arith.addf %3, %5 : vector<8x256xf32>
    %cst_6 = arith.constant 0.000000e+00 : f32
    %7 = vector.broadcast %cst_6 : f32 to vector<8x256xf32>
    %8 = arith.maximumf %6, %7 : vector<8x256xf32>
    %c0_7 = arith.constant 0 : index
    %c0_8 = arith.constant 0 : index
    %c0_9 = arith.constant 0 : index
    %9 = vector.load %arg5[%c0_7, %c0_8, %c0_9] : memref<1x8x256xf32, #tpu.memory_space<vmem>>, vector<1x8x256xf32>
    %10 = vector.shape_cast %9 : vector<1x8x256xf32> to vector<8x256xf32>
    %11 = vector.shape_cast %8 : vector<8x256xf32> to vector<1x8x256xf32>
    tpu.vector_store %arg5[%c0_7, %c0_8, %c0_9], %11 {strides = array<i32>} : memref<1x8x256xf32, #tpu.memory_space<vmem>>, vector<1x8x256xf32>,
    return
  }
  func.func @transform_0(%arg0: i32, %arg1: i32) -> (i32, i32) {
    %c0_i32 = arith.constant 0 : i32
    %c0_i32_0 = arith.constant 0 : i32
    %c0_i32_1 = arith.constant 0 : i32
    return %c0_i32, %c0_i32_0 : i32, i32
  }
  func.func @transform_1(%arg0: i32, %arg1: i32) -> (i32, i32, i32) {
    %c0_i32 = arith.constant 0 : i32
    %c0_i32_0 = arith.constant 0 : i32
    return %arg0, %c0_i32, %arg1 : i32, i32, i32
  }
  func.func @transform_2(%arg0: i32, %arg1: i32) -> (i32, i32) {
    %c0_i32 = arith.constant 0 : i32
    %c0_i32_0 = arith.constant 0 : i32
    %c0_i32_1 = arith.constant 0 : i32
    return %c0_i32, %c0_i32_0 : i32, i32
  }
  func.func @transform_3(%arg0: i32, %arg1: i32) -> (i32, i32, i32) {
    %c0_i32 = arith.constant 0 : i32
    %c0_i32_0 = arith.constant 0 : i32
    return %arg0, %c0_i32, %arg1 : i32, i32, i32
  }
}

</mosaic_0001>

<bundles_post_ra>
// kernel: conv_bn_relu.1
= control target key start
LH: loop header
LB: loop body
LE: loop exit
PB: predicated region body
PF: predicated region fallthrough
CT: control target
= control target key end

     0   :  { %s450_s12 = smov 0   ;;  %s452_s13 = smov 0   ;;  %s489_s0 = inlined_call_operand.vmem [shape: f32[8,4], index: 0, kind: input, shape index: {}]   ;;  %s490_s1 = inlined_call_operand.vmem [shape: f32[2,4,256], index: 1, kind: input, shape index: {}]   ;;  %s491_s2 = inlined_call_operand.vmem [shape: f32[8,1], index: 2, kind: input, shape index: {}]   ;;  %s492_s3 = inlined_call_operand.vmem [shape: f32[2,8,256], index: 3, kind: output, shape index: {}]  }
   0x1   :  { %s454_s14 = smov 0  }
   0x2 LB: > { %s25_s15 = sadd.s32 1, %s423_s13  ;;  %p366_p0 = scmp.ge.s32.totalorder %s427_s14, 1  ;;  %s427_s14 = sphi %s454_s14, %s13_s14   ;;  %s423_s13 = sphi %s452_s13, %s494_s13   ;;  %s419_s12 = sphi %s450_s12, %s493_s12  }
   0x3   : > { %p27_p1 = scmp.ge.s32.totalorder %s25_s15, 2  ;;  %p158_p2 = scmp.lt.s32.totalorder %s427_s14, 3 }
   0x5   : > { %s496_s15 = smov (%p27_p1, %s25_s15), 0  ;;  %p159_p3 = pnand %p366_p0, %p158_p2 }
   0x6   : > { %p191_p4 = scmp.lt.s32.totalorder (!%p159_p3), %s419_s12, 1 }
   0x7   : > { %162 = sbr.rel (%p159_p3) target bundleno = 157 (0x9d), region = 32 }
   0xc   : > { %v212_v0 = vld [vmem:[%s491_s2] sm:$0xff]  ;;  %v429_v1 = vmov 0   ;;  %s498_s12 = smov (!%p191_p4, %s419_s12), 1  ;;  %vm226_vm0 = vcmask 1043456   ;;  %vm222_vm1 = vcmask 31744  }
   0xd   : > { %404 = vset.pattern.permute.xlu0 %v429_v1  ;;  %s377_s18 = sshll.u32 %s498_s12, 3  ;;  %v210_v3 = vld [vmem:[%s489_s0] sm:$0xff]  ;;  %s378_s24 = sshll.u32 %s498_s12, 4 }
   0xe   : > { %215 = vperm.xlu0 %404, %v212_v0   ;;  %s198_s21 = scalar_lea.vmem %s490_s1, %s377_s18  ;;  %s208_s27 = scalar_lea.vmem %s492_s3, %s378_s24 }
   0xf   : > { %v211_v2 = vld [vmem:[%s198_s21] sm:$0xff] }
  0x10   : > { %219 = vst [vmem:[#allocation1] ss:$2 sm:$0xff] %v211_v2 }
  0x17   : > { %v220_v4 = vld.sshfl [vmem:[#allocation1] sm:$0xff pattern:$0x75316420]  ;;  %v221_v5 = vld.sshfl [vmem:[#allocation1 + $0x8] sm:$0xff pattern:$0x75316420] }
  0x18   : > { %371 = vmatpush.msk.msra.mxu0 %vm226_vm0, %v220_v4  ;;  %373 = vmatpush.msk.msra.mxu1 %vm226_vm0, %v221_v5 }
  0x19   : > { %372 = vmatmul.msk.f32.vlgmr.msra.gmra.mxu0 %vm222_vm1, %v210_v3  ;;  %374 = vmatmul.msk.f32.vlgmr.msra.gmra.mxu1 %vm222_vm1, %v210_v3 }
  0x80   : > { %v216_v6 = vpop.permute.xlu0 %215 }
  0x96   : > { %v248_v7 = vpop.f32.mrf.mxu0  ;;  %v268_v8 = vpop.f32.mrf.mxu1 }
  0x97   : > { %v249_v9 = vadd.f32 %v248_v7, %v216_v6  ;;  %v269_v10 = vadd.f32 %v268_v8, %v216_v6 }
  0x99   : > { %v271_v11 = vmax.f32 %v249_v9, 0.0  ;;  %v272_v12 = vmax.f32 %v269_v10, 0.0 }
  0x9b   : > { %273 = vst [vmem:[%s208_s27] sm:$0xff] %v271_v11 }
  0x9c   : > { %274 = vst [vmem:[%s208_s27 + $0x8] sm:$0xff] %v272_v12 }
  0x9d PF: > { %s13_s14 = sadd.s32 1, %s427_s14   ;;  %s493_s12 = smov %s423_s13 }
  0x9e   : > { %p10_p5 = scmp.ge.s32.totalorder %s13_s14, 4   ;;  %s494_s13 = smov %s496_s15 }
  0xa0   :  { %12 = sbr.rel (!%p10_p5) target bundleno = 2 (0x2), region = 62 }

</bundles_post_ra>
